<compile_context>
chip_gen: v7x
topology: tpu7x:2x2x1
jax: 0.10.0
libtpu: 0.0.40
codegen_flags: <defaults>
</compile_context>

<pallas_src>
import functools

import jax
import jax.numpy as jnp
from jax import lax
from jax.experimental import pallas as pl
from jax.experimental.pallas import tpu as pltpu

ALPHA = 0.95
GAMMA = 2.0
EPS = 1e-6

LANES = 128           # vreg lane width; last dim of the lane-dense layout
ROW_ALIGN = 16        # sublane alignment (covers bf16 (16,128) native tiles)
MAX_TILE_ROWS = 2048  # 2048 x 128 x f32 = 1 MiB per stream tile


def _round_up(x, m):
    return ((x + m - 1) // m) * m


def _focal_loss_kernel(info_ref, pred_ref, targ_ref, out_ref, acc_ref, *,
                       alpha, gamma, tile_rows):
    i = pl.program_id(0)

    @pl.when(i == 0)
    def _():
        acc_ref[...] = jnp.zeros_like(acc_ref)

    p = jnp.clip(pred_ref[...], EPS, 1.0 - EPS)
    t = targ_ref[...].astype(jnp.float32)

    # Fused blend (valid because targets are exactly 0/1):
    #   q     =  p       if t == 1 else  1 - p
    #   neg_w = -alpha   if t == 1 else -(1 - alpha)
    # so per-element loss = neg_w * (1-q)^gamma * log(q)  (already positive).
    q = (1.0 - p) + t * (2.0 * p - 1.0)
    neg_w = (alpha - 1.0) + (1.0 - 2.0 * alpha) * t
    one_minus_q = 1.0 - q
    if gamma == 2.0:
        mod = one_minus_q * one_minus_q          # VALU square, not EUP pow
    else:
        mod = one_minus_q ** gamma
    loss = neg_w * mod * jnp.log(q)

    n_full_rows = info_ref[0]   # number of fully-valid 128-wide rows
    n_rem = info_ref[1]         # valid lanes in the single partial row
    row_start = i * tile_rows

    def _accumulate(x):
        # vreg-wise fold: (tile_rows//8, 8, 128).sum(0) is pure vector adds.
        acc_ref[...] += x.reshape(tile_rows // 8, 8, LANES).sum(axis=0)

    @pl.when(row_start + tile_rows <= n_full_rows)
    def _():                      # interior tile: no masking work at all
        _accumulate(loss)

    @pl.when(row_start + tile_rows > n_full_rows)
    def _():                      # boundary / padded tile: mask invalid lanes
        rows = row_start + lax.broadcasted_iota(jnp.int32, (tile_rows, LANES), 0)
        lanes = lax.broadcasted_iota(jnp.int32, (tile_rows, LANES), 1)
        valid = (rows < n_full_rows) | ((rows == n_full_rows) & (lanes < n_rem))
        _accumulate(jnp.where(valid, loss, 0.0))

    @pl.when(i == pl.num_programs(0) - 1)
    def _():
        out_ref[...] = acc_ref[...]   # single lane-dense (8,128) writeback


def focal_loss(predictions, targets, *, alpha=ALPHA, gamma=GAMMA,
               reduction="mean"):
    """Pallas focal loss. predictions/targets: (B, 1) probabilities / 0-1 labels.

    Targets may be any float/int dtype holding exact 0/1 values (e.g. bf16 to
    halve their HBM traffic); they are cast to f32 inside the kernel.
    """
    assert predictions.shape == targets.shape
    if reduction not in ("mean", "sum"):
        # TODO(synk): 'none' reduction (per-element loss output) not wired up;
        # the module default ('mean') is what we reproduce here.
        raise NotImplementedError("only 'mean' and 'sum' reductions supported")

    n = predictions.size
    p_flat = jnp.ravel(predictions).astype(jnp.float32)
    t_flat = jnp.ravel(targets)                       # dtype preserved

    # Lane-dense layout: view the flat stream as (rows, 128).
    rows_needed = max(1, pl.cdiv(n, LANES))
    cap = min(MAX_TILE_ROWS, _round_up(rows_needed, ROW_ALIGN))
    tile_rows = cap
    if n % LANES == 0 and rows_needed % ROW_ALIGN == 0:
        # Prefer a tile size that exactly divides the row count -> zero-copy
        # reshape, no wrapper-side padding, no masked boundary tile.
        d = cap
        while d >= ROW_ALIGN and rows_needed % d != 0:
            d -= ROW_ALIGN
        if d >= ROW_ALIGN and 4 * d >= cap:   # don't accept pathologically small tiles
            tile_rows = d
    steps = -(-rows_needed // tile_rows)
    rows_padded = steps * tile_rows
    pad = rows_padded * LANES - n

    if pad == 0:
        pred2d = p_flat.reshape(rows_padded, LANES)   # zero-copy view
        targ2d = t_flat.reshape(rows_padded, LANES)
    else:
        # TODO(synk): for very large unaligned batches, DMA the aligned bulk
        # zero-copy and pad only a tiny tail tile instead of the whole stream.
        pred2d = jnp.pad(p_flat, (0, pad)).reshape(rows_padded, LANES)
        targ2d = jnp.pad(t_flat, (0, pad)).reshape(rows_padded, LANES)

    # Scalar-prefetched bounds (row-level + lane remainder: overflow-free).
    info = jnp.array([n // LANES, n % LANES], dtype=jnp.int32)

    kernel = functools.partial(
        _focal_loss_kernel, alpha=float(alpha), gamma=float(gamma),
        tile_rows=tile_rows)

    acc = pl.pallas_call(
        kernel,
        out_shape=jax.ShapeDtypeStruct((8, LANES), jnp.float32),
        grid_spec=pltpu.PrefetchScalarGridSpec(
            num_scalar_prefetch=1,
            grid=(steps,),
            in_specs=[
                pl.BlockSpec((tile_rows, LANES), lambda i, info: (i, 0)),
                pl.BlockSpec((tile_rows, LANES), lambda i, info: (i, 0)),
            ],
            out_specs=pl.BlockSpec((8, LANES), lambda i, info: (0, 0)),
            scratch_shapes=[pltpu.VMEM((8, LANES), jnp.float32)],
        ),
        compiler_params=pltpu.CompilerParams(
            dimension_semantics=("arbitrary",)),
    )(info, pred2d, targ2d)

    total = jnp.sum(acc)                              # final 1-vreg-tile reduce
    if reduction == "mean":
        return total * (1.0 / float(n))
    return total


def focal_loss_ref(predictions, targets, alpha=ALPHA, gamma=GAMMA):
    p = jnp.clip(predictions, EPS, 1.0 - EPS)
    t = targets
    pos = -alpha * (1.0 - p) ** gamma * t * jnp.log(p)
    neg = -(1.0 - alpha) * p ** gamma * (1.0 - t) * jnp.log(1.0 - p)
    return jnp.mean(pos + neg)


if __name__ == "__main__":
    key = jax.random.PRNGKey(0)
    kp, kt, kp2, kt2 = jax.random.split(key, 4)

    # Case 1: B=300 (not a multiple of 128) -> padded path + in-kernel boundary
    # mask; targets shipped as bf16 (exact 0/1) to exercise the narrow stream.
    B = 300
    predictions = jax.random.uniform(kp, (B, 1), jnp.float32,
                                     minval=0.01, maxval=0.99)
    targets = (jax.random.uniform(kt, (B, 1), jnp.float32) > 0.5).astype(
        jnp.float32)

    out = focal_loss(predictions, targets.astype(jnp.bfloat16))
    out = jax.block_until_ready(out)
    ref = focal_loss_ref(predictions, targets)
    assert jnp.allclose(out, ref, rtol=1e-5, atol=1e-6), (out, ref)

    # Case 2: B=2048 (lane-aligned) -> zero-copy reshape, unmasked fast path.
    B2 = 2048
    pred2 = jax.random.uniform(kp2, (B2, 1), jnp.float32,
                               minval=0.01, maxval=0.99)
    targ2 = (jax.random.uniform(kt2, (B2, 1), jnp.float32) > 0.5).astype(
        jnp.float32)
    out2 = jax.block_until_ready(focal_loss(pred2, targ2))
    ref2 = focal_loss_ref(pred2, targ2)
    assert jnp.allclose(out2, ref2, rtol=1e-5, atol=1e-6), (out2, ref2)

    print("KERNEL_OK")
</pallas_src>

<mosaic_0001>
module attributes {stable_mosaic.version = 11 : i64} {
  func.func @_focal_loss_kernel(%arg0: i32, %arg1: memref<2xi32, #tpu.memory_space<smem>>, %arg2: memref<16x128xf32, #tpu.memory_space<vmem>>, %arg3: memref<16x128xbf16, #tpu.memory_space<vmem>>, %arg4: memref<8x128xf32, #tpu.memory_space<vmem>>, %arg5: memref<8x128xf32, #tpu.memory_space<vmem>>) attributes {dimension_semantics = [#tpu.dimension_semantics<arbitrary>], iteration_bounds = array<i64: 1>, scalar_prefetch = 1 : i64, scratch_operands = 1 : i64, tpu.core_type = #tpu.core_type<tc>, window_params = [{transform_indices = @transform_0, window_bounds = array<i64: 16, 128>}, {transform_indices = @transform_1, window_bounds = array<i64: 16, 128>}, {pipeline_mode = #tpu.pipeline_mode<synchronous>, transform_indices = @transform_2, window_bounds = array<i64: 8, 128>}]} {
    %c0_i32 = arith.constant 0 : i32
    %0 = arith.cmpi eq, %arg0, %c0_i32 : i32
    %1 = arith.extui %0 : i1 to i32
    %c0_i32_0 = arith.constant 0 : i32
    %2 = arith.cmpi ne, %1, %c0_i32_0 : i32
    scf.if %2 {
      %cst_18 = arith.constant 0.000000e+00 : f32
      %42 = vector.broadcast %cst_18 : f32 to vector<8x128xf32>
      %c0_19 = arith.constant 0 : index
      %c0_20 = arith.constant 0 : index
      %43 = vector.load %arg5[%c0_19, %c0_20] : memref<8x128xf32, #tpu.memory_space<vmem>>, vector<8x128xf32>
      tpu.vector_store %arg5[%c0_19, %c0_20], %42 {strides = array<i32>} : memref<8x128xf32, #tpu.memory_space<vmem>>, vector<8x128xf32>,
    } else {
    }
    %c0 = arith.constant 0 : index
    %c0_1 = arith.constant 0 : index
    %3 = vector.load %arg2[%c0, %c0_1] : memref<16x128xf32, #tpu.memory_space<vmem>>, vector<16x128xf32>
    %cst = arith.constant 9.99999997E-7 : f32
    %cst_2 = arith.constant 0.999998986 : f32
    %4 = vector.broadcast %cst : f32 to vector<16x128xf32>
    %5 = arith.maximumf %4, %3 : vector<16x128xf32>
    %6 = vector.broadcast %cst_2 : f32 to vector<16x128xf32>
    %7 = arith.minimumf %6, %5 : vector<16x128xf32>
    %c0_3 = arith.constant 0 : index
    %c0_4 = arith.constant 0 : index
    %8 = vector.load %arg3[%c0_3, %c0_4] : memref<16x128xbf16, #tpu.memory_space<vmem>>, vector<16x128xbf16>
    %9 = arith.extf %8 : vector<16x128xbf16> to vector<16x128xf32>
    %cst_5 = arith.constant 1.000000e+00 : f32
    %10 = vector.broadcast %cst_5 : f32 to vector<16x128xf32>
    %11 = arith.subf %10, %7 : vector<16x128xf32>
    %cst_6 = arith.constant 2.000000e+00 : f32
    %12 = vector.broadcast %cst_6 : f32 to vector<16x128xf32>
    %13 = arith.mulf %12, %7 : vector<16x128xf32>
    %cst_7 = arith.constant 1.000000e+00 : f32
    %14 = vector.broadcast %cst_7 : f32 to vector<16x128xf32>
    %15 = arith.subf %13, %14 : vector<16x128xf32>
    %16 = arith.mulf %9, %15 : vector<16x128xf32>
    %17 = arith.addf %11, %16 : vector<16x128xf32>
    %cst_8 = arith.constant -0.899999976 : f32
    %18 = vector.broadcast %cst_8 : f32 to vector<16x128xf32>
    %19 = arith.mulf %18, %9 : vector<16x128xf32>
    %cst_9 = arith.constant -5.000000e-02 : f32
    %20 = vector.broadcast %cst_9 : f32 to vector<16x128xf32>
    %21 = arith.addf %20, %19 : vector<16x128xf32>
    %cst_10 = arith.constant 1.000000e+00 : f32
    %22 = vector.broadcast %cst_10 : f32 to vector<16x128xf32>
    %23 = arith.subf %22, %17 : vector<16x128xf32>
    %24 = arith.mulf %23, %23 : vector<16x128xf32>
    %25 = arith.mulf %21, %24 : vector<16x128xf32>
    %26 = math.log %17 : vector<16x128xf32>
    %27 = arith.mulf %25, %26 : vector<16x128xf32>
    %c0_11 = arith.constant 0 : index
    %28 = memref.load %arg1[%c0_11] : memref<2xi32, #tpu.memory_space<smem>>
    %c1 = arith.constant 1 : index
    %29 = memref.load %arg1[%c1] : memref<2xi32, #tpu.memory_space<smem>>
    %c16_i32 = arith.constant 16 : i32
    %30 = arith.muli %arg0, %c16_i32 : i32
    %c16_i32_12 = arith.constant 16 : i32
    %31 = arith.addi %30, %c16_i32_12 : i32
    %32 = arith.cmpi sle, %31, %28 : i32
    %33 = arith.extui %32 : i1 to i32
    %c0_i32_13 = arith.constant 0 : i32
    %34 = arith.cmpi ne, %33, %c0_i32_13 : i32
    scf.if %34 {
      %c0_18 = arith.constant 0 : index
      %c0_19 = arith.constant 0 : index
      %42 = vector.load %arg5[%c0_18, %c0_19] : memref<8x128xf32, #tpu.memory_space<vmem>>, vector<8x128xf32>
      %43 = vector.shape_cast %27 : vector<16x128xf32> to vector<2x8x128xf32>
      %cst_20 = arith.constant dense<0.000000e+00> : vector<8x128xf32>
      %44 = vector.multi_reduction <add>, %43, %cst_20 [0] : vector<2x8x128xf32> to vector<8x128xf32>
      %45 = arith.addf %42, %44 : vector<8x128xf32>
      %c0_21 = arith.constant 0 : index
      %c0_22 = arith.constant 0 : index
      %46 = vector.load %arg5[%c0_21, %c0_22] : memref<8x128xf32, #tpu.memory_space<vmem>>, vector<8x128xf32>
      tpu.vector_store %arg5[%c0_21, %c0_22], %45 {strides = array<i32>} : memref<8x128xf32, #tpu.memory_space<vmem>>, vector<8x128xf32>,
    } else {
    }
    %c16_i32_14 = arith.constant 16 : i32
    %35 = arith.addi %30, %c16_i32_14 : i32
    %36 = arith.cmpi sgt, %35, %28 : i32
    %37 = arith.extui %36 : i1 to i32
    %c0_i32_15 = arith.constant 0 : i32
    %38 = arith.cmpi ne, %37, %c0_i32_15 : i32
    scf.if %38 {
      %42 = tpu.iota {dimensions = array<i32: 0>} : vector<16x128xi32>
      %43 = vector.broadcast %30 : i32 to vector<16x128xi32>
      %44 = arith.addi %43, %42 : vector<16x128xi32>
      %45 = tpu.iota {dimensions = array<i32: 1>} : vector<16x128xi32>
      %46 = vector.broadcast %28 : i32 to vector<16x128xi32>
      %47 = arith.cmpi slt, %44, %46 : vector<16x128xi32>
      %48 = vector.broadcast %28 : i32 to vector<16x128xi32>
      %49 = arith.cmpi eq, %44, %48 : vector<16x128xi32>
      %50 = vector.broadcast %29 : i32 to vector<16x128xi32>
      %51 = arith.cmpi slt, %45, %50 : vector<16x128xi32>
      %52 = arith.andi %49, %51 : vector<16x128xi1>
      %53 = arith.ori %47, %52 : vector<16x128xi1>
      %cst_18 = arith.constant 0.000000e+00 : f32
      %54 = vector.broadcast %cst_18 : f32 to vector<16x128xf32>
      %55 = arith.select %53, %27, %54 : vector<16x128xi1>, vector<16x128xf32>
      %c0_19 = arith.constant 0 : index
      %c0_20 = arith.constant 0 : index
      %56 = vector.load %arg5[%c0_19, %c0_20] : memref<8x128xf32, #tpu.memory_space<vmem>>, vector<8x128xf32>
      %57 = vector.shape_cast %55 : vector<16x128xf32> to vector<2x8x128xf32>
      %cst_21 = arith.constant dense<0.000000e+00> : vector<8x128xf32>
      %58 = vector.multi_reduction <add>, %57, %cst_21 [0] : vector<2x8x128xf32> to vector<8x128xf32>
      %59 = arith.addf %56, %58 : vector<8x128xf32>
      %c0_22 = arith.constant 0 : index
      %c0_23 = arith.constant 0 : index
      %60 = vector.load %arg5[%c0_22, %c0_23] : memref<8x128xf32, #tpu.memory_space<vmem>>, vector<8x128xf32>
      tpu.vector_store %arg5[%c0_22, %c0_23], %59 {strides = array<i32>} : memref<8x128xf32, #tpu.memory_space<vmem>>, vector<8x128xf32>,
    } else {
    }
    %c0_i32_16 = arith.constant 0 : i32
    %39 = arith.cmpi eq, %arg0, %c0_i32_16 : i32
    %40 = arith.extui %39 : i1 to i32
    %c0_i32_17 = arith.constant 0 : i32
    %41 = arith.cmpi ne, %40, %c0_i32_17 : i32
    scf.if %41 {
      %c0_18 = arith.constant 0 : index
      %c0_19 = arith.constant 0 : index
      %42 = vector.load %arg5[%c0_18, %c0_19] : memref<8x128xf32, #tpu.memory_space<vmem>>, vector<8x128xf32>
      %c0_20 = arith.constant 0 : index
      %c0_21 = arith.constant 0 : index
      %43 = vector.load %arg4[%c0_20, %c0_21] : memref<8x128xf32, #tpu.memory_space<vmem>>, vector<8x128xf32>
      tpu.vector_store %arg4[%c0_20, %c0_21], %42 {strides = array<i32>} : memref<8x128xf32, #tpu.memory_space<vmem>>, vector<8x128xf32>,
    } else {
    }
    return
  }
  func.func @transform_0(%arg0: i32, %arg1: memref<2xi32, #tpu.memory_space<smem>>) -> (i32, i32) {
    %c0_i32 = arith.constant 0 : i32
    %c0_i32_0 = arith.constant 0 : i32
    return %arg0, %c0_i32 : i32, i32
  }
  func.func @transform_1(%arg0: i32, %arg1: memref<2xi32, #tpu.memory_space<smem>>) -> (i32, i32) {
    %c0_i32 = arith.constant 0 : i32
    %c0_i32_0 = arith.constant 0 : i32
    return %arg0, %c0_i32 : i32, i32
  }
  func.func @transform_2(%arg0: i32, %arg1: memref<2xi32, #tpu.memory_space<smem>>) -> (i32, i32) {
    %c0_i32 = arith.constant 0 : i32
    %c0_i32_0 = arith.constant 0 : i32
    %c0_i32_1 = arith.constant 0 : i32
    return %c0_i32, %c0_i32_0 : i32, i32
  }
}

</mosaic_0001>

<bundles_post_ra>
// kernel: tpu_custom_call.1
= control target key start
LH: loop header
LB: loop body
LE: loop exit
PB: predicated region body
PF: predicated region fallthrough
CT: control target
= control target key end

     0   :  { %s341_s0 = inlined_call_operand.hbm [shape: s32[2], index: 0, kind: input, shape index: {}]   ;;  %s342_s1 = inlined_call_operand.hbm [shape: f32[16,128], index: 1, kind: input, shape index: {}]   ;;  %s343_s2 = inlined_call_operand.hbm [shape: bf16[16,128], index: 2, kind: input, shape index: {}]   ;;  %s344_s3 = inlined_call_operand.hbm [shape: f32[8,128], index: 3, kind: output, shape index: {}]  }
   0x1   :  { %s172_s14 = scalar_lea.hbm %s341_s0, 16 }
   0x2   :  { %p173_p0 = scmp.ne.s32.totalorder %s341_s0, %s172_s14  ;;  %p176_p1 = scmp.lt.u32.totalorder %s172_s14, %s341_s0 }
   0x4   :  { %p178_p2 = pnand %p176_p1, %p173_p0 }
   0x6   :  { %181 = shalt.err (!%p178_p2)  }
   0x7   :  { %s256_s19 = smov [#allocation4]  }
   0x8   :  { %9 = dma.hbm_to_smem %s341_s0, 16, %s256_s19, [#allocation3] }
   0x9   :  { %248 = dma.done.wait [#allocation3], 16 }
   0xa   :  { %249 = vsyncadd [#allocation3], 4294967280 }
   0xb   :  { %11 = sfence }
   0xc   :  { %12 = vsyncpa [#allocation6], 0 }
   0xd   :  { %13 = vsyncpa [#allocation9], 0 }
   0xe   :  { %14 = vsyncpa [#allocation7], 0  ;;  %s257_s22 = smov [#allocation5]   ;;  %s182_s26 = scalar_lea.hbm %s342_s1, 256 }
   0xf   :  { %s20_s23 = sshll.u32 %s257_s22, 4  ;;  %p183_p3 = scmp.ne.s32.totalorder %s342_s1, %s182_s26  ;;  %s21_s23 = int_to_ptr.vmem [resolvable:$true] %s20_s23 }
  0x10   :  { %p186_p4 = scmp.lt.u32.totalorder %s182_s26, %s342_s1 }
  0x12   :  { %p188_p5 = pnand %p186_p4, %p183_p3 }
  0x14   :  { %191 = shalt.err (!%p188_p5)
}
  0x15   :  { %s192_s0 = scalar_lea.vmem %s21_s23, 256  ;;  %p197_p7 = scmp.lt.s32.totalorder %s21_s23, %s21_s23 }
  0x16   :  { %p193_p6 = scmp.ne.s32.totalorder %s21_s23, %s192_s0  ;;  %p198_p8 = scmp.lt.s32.totalorder %s192_s0, %s192_s0 }
  0x18   :  { %p199_p9 = por %p198_p8, %p197_p7 }
  0x1a   :  { %p200_p10 = pnand %p199_p9, %p193_p6 }
  0x1c   :  { %203 = shalt.err (!%p200_p10)
}
  0x1d   :  { %s258_s4 = smov 128   ;;  %s259_s5 = smov 8  }
  0x1e   :  { %26 = dma.hbm_to_vmem [thread:$0]  %s342_s1, 256, %s21_s23, [#allocation6], %s258_s4, %s258_s4, %s259_s5  }
  0x1f   :  { %s260_s8 = smov [#allocation8]   ;;  %s204_s12 = scalar_lea.hbm %s343_s2, 128 }
  0x20   :  { %s32_s9 = sshll.u32 %s260_s8, 4  ;;  %p205_p11 = scmp.ne.s32.totalorder %s343_s2, %s204_s12  ;;  %s33_s9 = int_to_ptr.vmem [resolvable:$true] %s32_s9 }
  0x21   :  { %p208_p12 = scmp.lt.u32.totalorder %s204_s12, %s343_s2 }
  0x23   :  { %p210_p13 = pnand %p208_p12, %p205_p11 }
  0x25   :  { %213 = shalt.err (!%p210_p13)
}
  0x26   :  { %s214_s17 = scalar_lea.vmem %s33_s9, 128  ;;  %p219_p1 = scmp.lt.s32.totalorder %s33_s9, %s33_s9 }
  0x27   :  { %p215_p0 = scmp.ne.s32.totalorder %s33_s9, %s214_s17  ;;  %p220_p2 = scmp.lt.s32.totalorder %s214_s17, %s214_s17 }
  0x29   :  { %p221_p3 = por %p220_p2, %p219_p1 }
  0x2b   :  { %p222_p4 = pnand %p221_p3, %p215_p0 }
  0x2d   :  { %225 = shalt.err (!%p222_p4)
}
  0x2e   :  { %s261_s1 = smov 64   ;;  %s262_s18 = smov 4  }
  0x2f   :  { %38 = dma.hbm_to_vmem [thread:$0]  %s343_s2, 128, %s33_s9, [#allocation9], %s261_s1, %s261_s1, %s262_s18  }
  0x30   :  { %250 = dma.done.wait [#allocation6], 256  }
  0x31   :  { %251 = vsyncadd [#allocation6], 4294967040 }
  0x32   :  { %252 = dma.done.wait [#allocation9], 128  }
  0x33   :  { %253 = vsyncadd [#allocation9], 4294967168  ;;  %s321_s21 = sld [smem:[#allocation4]]  ;;  %s323_s22 = sld [smem:[#allocation4 + $0x1]]  ;;  %v263_v0 = vmov 0.0   ;;  %v50_v1 = vld [vmem:[#allocation5] sm:$0xff] }
  0x34   :  { %49 = vst [vmem:[#allocation2] sm:$0xff] %v263_v0  ;;  %v51_v2 = vld [vmem:[#allocation5 + $0x8] sm:$0xff]  ;;  %v52_v3 = vmax.f32 %v50_v1, 1e-06  ;;  %v156_v5 = vld [vmem:[#allocation8] sm:$0xff]  }
  0x35   :  { %v53_v4 = vmax.f32 %v51_v2, 1e-06  ;;  %v157_v8 = vunpack.c.l.bf16 %v156_v5  ;;  %v158_v9 = vunpack.c.h.bf16 %v156_v5 }
  0x36   :  { %v54_v6 = vmin.f32 %v52_v3, 0.999999 }
  0x37   :  { %v55_v7 = vmin.f32 %v53_v4, 0.999999  ;;  %v70_v20 = vmul.f32 -0.9, %v157_v8  ;;  %v71_v22 = vmul.f32 -0.9, %v158_v9 }
  0x38   :  { %v62_v10 = vmul.f32 2.0, %v54_v6  ;;  %v60_v12 = vsub.f32 1.0, %v54_v6 }
  0x39   :  { %v63_v11 = vmul.f32 2.0, %v55_v7  ;;  %v61_v13 = vsub.f32 1.0, %v55_v7  ;;  %v72_v24 = vadd.f32 -0.05, %v70_v20  ;;  %v73_v26 = vadd.f32 -0.05, %v71_v22 }
  0x3a   :  { %v148_v14 = vadd.f32 -1.0, %v62_v10  ;;  %p152_p5 = scmp.lt.s32.totalorder %s321_s21, 16 }
  0x3b   :  { %v149_v15 = vadd.f32 -1.0, %v63_v11  ;;  %v94_v36 = vld [vmem:[#allocation2] sm:$0xff] (!%p152_p5) }
  0x3c   :  { %v66_v16 = vmul.f32 %v157_v8, %v148_v14 }
  0x3d   :  { %v67_v17 = vmul.f32 %v158_v9, %v149_v15 }
  0x3e   :  { %v68_v18 = vadd.f32 %v66_v16, %v60_v12 }
  0x3f   :  { %v69_v19 = vadd.f32 %v67_v17, %v61_v13 }
  0x40   :  { %168 = vlog2.f32 %v68_v18  ;;  %v74_v21 = vsub.f32 1.0, %v68_v18 }
  0x41   :  { %170 = vlog2.f32 %v69_v19  ;;  %v75_v23 = vsub.f32 1.0, %v69_v19 }
  0x42   :  { %v76_v25 = vmul.f32 %v74_v21, %v74_v21 }
  0x43   :  { %v77_v27 = vmul.f32 %v75_v23, %v75_v23 }
  0x44   :  { %v78_v28 = vmul.f32 %v76_v25, %v72_v24 }
  0x45   :  { %v79_v30 = vmul.f32 %v77_v27, %v73_v26 }
  0x48   :  { %93 = sbr.rel (%p152_p5) target bundleno = 85 (0x55), region = 25 }
  0x4a   :  { %v169_v29 = vpop.eup %168 }
  0x4b   :  { %v171_v31 = vpop.eup %170  ;;  %v81_v32 = vmul.f32 0.6931472, %v169_v29 }
  0x4c   :  { %v83_v33 = vmul.f32 0.6931472, %v171_v31 }
  0x4d   :  { %v84_v34 = vmul.f32 %v81_v32, %v78_v28 }
  0x4e   :  { %v85_v35 = vmul.f32 %v83_v33, %v79_v30 }
  0x50   :  { %v95_v37 = vadd.f32 %v85_v35, %v84_v34 }
  0x52   :  { %v96_v38 = vadd.f32 %v95_v37, %v94_v36 }
  0x54   :  { %97 = vst [vmem:[#allocation2] sm:$0xff] %v96_v38 }
  0x55 PF:  { %p154_p6 = scmp.ge.s32.totalorder %s321_s21, 16 }
  0x56   :  { %v102_v39 = vlaneseq (!%p154_p6)  ;;  %v110_v40 = vstv (!%p154_p6), %s321_s21  ;;  %v115_v41 = vstv (!%p154_p6), %s323_s22 }
  0x57   :  { %101 = sbr.rel (%p154_p6) target bundleno = 101 (0x65), region = 29 }
  0x58   :  { %v103_v42 = vshrl.u32 (!%p154_p6), %v102_v39, 7  ;;  %v109_v43 = vand.u32 (!%p154_p6), 127, %v102_v39 }
  0x5a   :  { %v104_v44 = vadd.s32 (!%p154_p6), 8, %v103_v42  ;;  %vm111_vm0 = vcmp.lt.s32.totalorder (!%p154_p6), %v103_v42, %v110_v40  ;;  %vm113_vm1 = vcmp.eq.s32.totalorder (!%p154_p6), %v103_v42, %v110_v40  ;;  %vm116_vm2 = vcmp.lt.s32.totalorder (!%p154_p6), %v109_v43, %v115_v41 }
  0x5b   :  { %vm117_vm3 = vmand (!%p154_p6), %vm113_vm1, %vm116_vm2  ;;  %v123_v47 = vld [vmem:[#allocation2] sm:$0xff] (!%p154_p6) }
  0x5c   :  { %vm112_vm4 = vcmp.lt.s32.totalorder (!%p154_p6), %v104_v44, %v110_v40  ;;  %vm114_vm5 = vcmp.eq.s32.totalorder (!%p154_p6), %v104_v44, %v110_v40  ;;  %vm119_vm6 = vmor (!%p154_p6), %vm111_vm0, %vm117_vm3 }
  0x5d   :  { %vm118_vm7 = vmand (!%p154_p6), %vm114_vm5, %vm116_vm2  ;;  %v121_v45 = vsel (!%p154_p6), %vm119_vm6, %v84_v34, 0.0 }
  0x5e   :  { %vm120_vm8 = vmor %vm112_vm4, %vm118_vm7 }
  0x5f   :  { %v122_v46 = vsel %vm120_vm8, %v85_v35, 0.0 }
  0x60   :  { %v124_v48 = vadd.f32 %v122_v46, %v121_v45 }
  0x62   :  { %v125_v49 = vadd.f32 %v124_v48, %v123_v47 }
  0x64   :  { %126 = vst [vmem:[#allocation2] sm:$0xff] %v125_v49 }
  0x65 PF:  { %s264_s2 = smov [#allocation10]  }
  0x66   :  { %s138_s23 = sshll.u32 %s264_s2, 4  ;;  %s139_s23 = int_to_ptr.vmem [resolvable:$true] %s138_s23 }
  0x67   :  { %s226_s24 = scalar_lea.vmem %s139_s23, 128  ;;  %p231_p8 = scmp.lt.s32.totalorder %s139_s23, %s139_s23 }
  0x68   :  { %p227_p7 = scmp.ne.s32.totalorder %s139_s23, %s226_s24  ;;  %p232_p9 = scmp.lt.s32.totalorder %s226_s24, %s226_s24 }
  0x6a   :  { %p233_p10 = por %p232_p9, %p231_p8 }
  0x6b   :  { %v130_v50 = vld [vmem:[#allocation2] sm:$0xff] }
  0x6c   :  { %131 = vst [vmem:[#allocation10] sm:$0xff] %v130_v50  ;;  %p234_p11 = pnand %p233_p10, %p227_p7 }
  0x6e   :  { %237 = shalt.err (!%p234_p11)
}
  0x6f   :  { %s238_s27 = scalar_lea.hbm %s344_s3, 128 }
  0x70   :  { %p239_p12 = scmp.ne.s32.totalorder %s344_s3, %s238_s27  ;;  %p242_p13 = scmp.lt.u32.totalorder %s238_s27, %s344_s3 }
  0x72   :  { %p244_p0 = pnand %p242_p13, %p239_p12 }
  0x74   :  { %247 = shalt.err (!%p244_p0)
}
  0x75   :  { %141 = dma.vmem_to_hbm [thread:$0]  %s139_s23, 128, %s344_s3, [#allocation7]  }
  0x76   :  { %254 = dma.done.wait [#allocation7], 128  }
  0x77   :  { %255 = vsyncadd [#allocation7], 4294967168 }
  0x78   :  { %145 = vsyncpa [#allocation6], 1 }
  0x79   :  { %146 = vsyncpa [#allocation9], 1 }
  0x7a   :  { %147 = vsyncpa [#allocation7], 1 }

</bundles_post_ra>
